<compile_context>
chip_gen: v5e
topology: v5e:2x2
jax: 0.10.0
libtpu: 0.0.40
codegen_flags: <defaults>
</compile_context>

<pallas_src>
import functools

import jax
import jax.numpy as jnp
from jax import lax
from jax.experimental import pallas as pl
from jax.experimental.pallas import tpu as pltpu

POWER = 0.2
LANE = 128
CHUNK_ROWS = 512                  # rows per in-kernel compute chunk (64 f32 vregs)
BLOCK_BYTES = 4 * 1024 * 1024     # HBM bytes streamed per grid step (per buffer)

# (6/5) * (127 - 0.0450466) * 2**23 : exponent-bitcast seed for y ~= x**(-1/5)
_FIFTH_ROOT_MAGIC = 1277970405.0


def _fifth_root(x):
    """x**0.2 for x >= 0 using only VPU mul/add (no EUP exp/log).

    Bitcast-exponent seed (~4% rel error) + 4 Newton steps of
    y <- y * (1 + (1 - x*y^5)/5)  (converges to x**(-1/5)), then x*y^4.
    ~1e-7 relative error for normal-range f32 inputs.
    """
    ix = pltpu.bitcast(x, jnp.int32).astype(jnp.float32)
    y = pltpu.bitcast((_FIFTH_ROOT_MAGIC - 0.2 * ix).astype(jnp.int32), jnp.float32)
    for _ in range(4):
        y2 = y * y
        y4 = y2 * y2
        y = y + 0.2 * (y * (1.0 - x * (y4 * y)))
    y2 = y * y
    return x * (y2 * y2)          # x * y^4 = x**(1/5)


def _sparsity_kernel(x_ref, o_ref, acc_ref, *,
                     tile_rows, chunk, n_chunks, steps, total_rows):
    """Accumulate sum(|x|**0.2) into a per-core (8,128) f32 VMEM accumulator."""
    c = pl.program_id(0)          # core-split axis ("parallel")
    i = pl.program_id(1)          # streaming/reduction axis ("arbitrary")

    @pl.when(i == 0)
    def _():
        acc_ref[...] = jnp.zeros_like(acc_ref)

    # Rows of the real (unpadded) array that fall inside this block.  May be
    # <= 0 for the dummy block of an odd 2-core split, or > tile_rows inside.
    rows_left = total_rows - (c * steps + i) * tile_rows

    def chunk_sum(r0, limit):
        xb = x_ref[pl.ds(r0, chunk), :].astype(jnp.float32)
        ax = jnp.abs(xb)
        # |x|**0.2 with an exact 0 at x == 0 (matches torch).
        # TODO(synk): NaN inputs contribute 0 here instead of poisoning the mean.
        powed = jnp.where(ax > 0.0, _fifth_root(ax), 0.0)
        if limit is not None:                       # ragged boundary chunk only
            row = lax.broadcasted_iota(jnp.int32, (chunk, LANE), 0)
            powed = jnp.where(row < limit, powed, 0.0)
        # Fold groups of 8 rows together: pure VPU adds, no cross-lane work.
        return jnp.sum(powed.reshape(chunk // 8, 8, LANE), axis=0)

    @pl.loop(0, n_chunks)
    def _(j):
        r0 = pl.multiple_of(j * chunk, chunk)
        rem = rows_left - j * chunk                 # valid rows in this chunk

        @pl.when(rem >= chunk)                      # hot path: full chunk, no mask
        def _():
            acc_ref[...] += chunk_sum(r0, None)

        @pl.when(jnp.logical_and(rem > 0, rem < chunk))
        def _():
            acc_ref[...] += chunk_sum(r0, rem)
        # rem <= 0: chunk is entirely padding -> skip.

    @pl.when(i == pl.num_programs(1) - 1)
    def _():
        o_ref[0, 0] = jnp.sum(acc_ref[...])         # single XLU reduce per core


def _round_up(v, m):
    return (v + m - 1) // m * m


@jax.jit
def sparsity_loss(x):
    """mean(|x|**0.2) over all elements, reduction done in a Pallas kernel."""
    n = x.size
    flat = x.reshape(-1)

    # No full-tensor pad: kernel consumes the 128-aligned prefix; the <128
    # element remainder is reduced with plain XLA.
    n_main = (n // LANE) * LANE
    tail_sum = jnp.float32(0.0)
    if n_main < n:
        tail = jnp.abs(flat[n_main:]).astype(jnp.float32)
        tail_sum = jnp.sum(tail ** jnp.float32(POWER))
    if n_main == 0:
        return tail_sum / jnp.float32(n)

    mat = (flat if n_main == n else flat[:n_main]).reshape(-1, LANE)
    rows = mat.shape[0]
    itemsize = jnp.dtype(x.dtype).itemsize

    # ~4 MiB per block, rows aligned for sub-32-bit sublane packing.
    row_align = 8 * max(1, 4 // itemsize)
    desired = _round_up(max(BLOCK_BYTES // (LANE * itemsize), row_align), CHUNK_ROWS)
    tile = min(desired, _round_up(rows, row_align))
    chunk = min(CHUNK_ROWS, tile)
    tile = _round_up(tile, chunk)
    n_chunks = tile // chunk

    nblocks = pl.cdiv(rows, tile)
    num_cores = 2 if nblocks >= 2 else 1     # v7x: shard across both TensorCores
    steps = pl.cdiv(nblocks, num_cores)

    kernel = functools.partial(
        _sparsity_kernel, tile_rows=tile, chunk=chunk, n_chunks=n_chunks,
        steps=steps, total_rows=rows)

    partials = pl.pallas_call(
        kernel,
        out_shape=jax.ShapeDtypeStruct((num_cores, 1), jnp.float32),
        grid=(num_cores, steps),
        in_specs=[pl.BlockSpec(
            (tile, LANE),
            lambda c, i: (jnp.minimum(c * steps + i, nblocks - 1), 0))],
        out_specs=pl.BlockSpec((1, 1), lambda c, i: (c, 0),
                               memory_space=pltpu.SMEM),
        scratch_shapes=[pltpu.VMEM((8, LANE), jnp.float32)],
        compiler_params=pltpu.CompilerParams(
            dimension_semantics=("parallel", "arbitrary")),
    )(mat)

    return (jnp.sum(partials) + tail_sum) / jnp.float32(n)


if __name__ == "__main__":
    key = jax.random.PRNGKey(0)

    # Conv-kernel-like tensor (out_ch, in_ch, kh, kw) = (2, 4, 16, 16).
    x = jax.random.normal(key, (2, 4, 16, 16), dtype=jnp.float32)
    out = jax.block_until_ready(sparsity_loss(x))
    ref = jnp.mean(jnp.abs(x) ** POWER)
    assert jnp.allclose(out, ref, rtol=2e-5, atol=1e-6), (out, ref)

    # Ragged shape: exercises the in-kernel row mask and the XLA tail path.
    x2 = jax.random.normal(jax.random.PRNGKey(1), (2, 3, 16, 17), dtype=jnp.float32)
    out2 = jax.block_until_ready(sparsity_loss(x2))
    ref2 = jnp.mean(jnp.abs(x2) ** POWER)
    assert jnp.allclose(out2, ref2, rtol=2e-5, atol=1e-6), (out2, ref2)

    print("KERNEL_OK")
</pallas_src>

<mosaic_0001>
module attributes {stable_mosaic.version = 11 : i64} {
  func.func @_sparsity_kernel(%arg0: i32, %arg1: i32, %arg2: memref<16x128xf32, #tpu.memory_space<vmem>>, %arg3: memref<1x1xf32, #tpu.memory_space<smem>>, %arg4: memref<8x128xf32, #tpu.memory_space<vmem>>) attributes {dimension_semantics = [#tpu.dimension_semantics<parallel>, #tpu.dimension_semantics<arbitrary>], iteration_bounds = array<i64: 1, 1>, scalar_prefetch = 0 : i64, scratch_operands = 1 : i64, tpu.core_type = #tpu.core_type<tc>, window_params = [{transform_indices = @transform_0, window_bounds = array<i64: 16, 128>}, {transform_indices = @transform_1, window_bounds = array<i64: 1, 1>}]} {
    %c0_i32 = arith.constant 0 : i32
    %0 = arith.cmpi eq, %arg1, %c0_i32 : i32
    %1 = arith.extui %0 : i1 to i32
    %c0_i32_0 = arith.constant 0 : i32
    %2 = arith.cmpi ne, %1, %c0_i32_0 : i32
    scf.if %2 {
      %cst = arith.constant 0.000000e+00 : f32
      %24 = vector.broadcast %cst : f32 to vector<8x128xf32>
      %c0 = arith.constant 0 : index
      %c0_15 = arith.constant 0 : index
      %25 = vector.load %arg4[%c0, %c0_15] : memref<8x128xf32, #tpu.memory_space<vmem>>, vector<8x128xf32>
      tpu.vector_store %arg4[%c0, %c0_15], %24 {strides = array<i32>} : memref<8x128xf32, #tpu.memory_space<vmem>>, vector<8x128xf32>,
    } else {
    }
    %c1_i32 = arith.constant 1 : i32
    %3 = arith.muli %arg0, %c1_i32 : i32
    %4 = arith.addi %3, %arg1 : i32
    %c16_i32 = arith.constant 16 : i32
    %5 = arith.muli %4, %c16_i32 : i32
    %c16_i32_1 = arith.constant 16 : i32
    %6 = arith.subi %c16_i32_1, %5 : i32
    %c0_i32_2 = arith.constant 0 : i32
    %c1_i32_3 = arith.constant 1 : i32
    %7 = arith.muli %c0_i32_2, %c1_i32_3 : i32
    %c0_i32_4 = arith.constant 0 : i32
    %8 = arith.addi %c0_i32_4, %7 : i32
    %c16_i32_5 = arith.constant 16 : i32
    %9 = arith.muli %8, %c16_i32_5 : i32
    %10 = tpu.assume_multiple %9, 16 : i32
    %c16_i32_6 = arith.constant 16 : i32
    %11 = arith.muli %8, %c16_i32_6 : i32
    %12 = arith.subi %6, %11 : i32
    %c16_i32_7 = arith.constant 16 : i32
    %13 = arith.cmpi sge, %12, %c16_i32_7 : i32
    %14 = arith.extui %13 : i1 to i32
    %c0_i32_8 = arith.constant 0 : i32
    %15 = arith.cmpi ne, %14, %c0_i32_8 : i32
    scf.if %15 {
      %c0 = arith.constant 0 : index
      %c0_15 = arith.constant 0 : index
      %24 = vector.load %arg4[%c0, %c0_15] : memref<8x128xf32, #tpu.memory_space<vmem>>, vector<8x128xf32>
      %25 = arith.index_cast %10 : i32 to index
      %c0_16 = arith.constant 0 : index
      %26 = vector.load %arg2[%25, %c0_16] : memref<16x128xf32, #tpu.memory_space<vmem>>, vector<16x128xf32>
      %27 = math.absf %26 : vector<16x128xf32>
      %cst = arith.constant 0.000000e+00 : f32
      %28 = vector.broadcast %cst : f32 to vector<16x128xf32>
      %29 = arith.cmpf ogt, %27, %28 : vector<16x128xf32>
      %30 = tpu.bitcast %27 : vector<16x128xf32> -> vector<16x128xi32>
      %31 = arith.sitofp %30 : vector<16x128xi32> to vector<16x128xf32>
      %cst_17 = arith.constant 2.000000e-01 : f32
      %32 = vector.broadcast %cst_17 : f32 to vector<16x128xf32>
      %33 = arith.mulf %32, %31 : vector<16x128xf32>
      %cst_18 = arith.constant 1.27797043E+9 : f32
      %34 = vector.broadcast %cst_18 : f32 to vector<16x128xf32>
      %35 = arith.subf %34, %33 : vector<16x128xf32>
      %36 = arith.fptosi %35 : vector<16x128xf32> to vector<16x128xi32>
      %37 = tpu.bitcast %36 : vector<16x128xi32> -> vector<16x128xf32>
      %38 = arith.mulf %37, %37 : vector<16x128xf32>
      %39 = arith.mulf %38, %38 : vector<16x128xf32>
      %40 = arith.mulf %39, %37 : vector<16x128xf32>
      %41 = arith.mulf %27, %40 : vector<16x128xf32>
      %cst_19 = arith.constant 1.000000e+00 : f32
      %42 = vector.broadcast %cst_19 : f32 to vector<16x128xf32>
      %43 = arith.subf %42, %41 : vector<16x128xf32>
      %44 = arith.mulf %37, %43 : vector<16x128xf32>
      %cst_20 = arith.constant 2.000000e-01 : f32
      %45 = vector.broadcast %cst_20 : f32 to vector<16x128xf32>
      %46 = arith.mulf %45, %44 : vector<16x128xf32>
      %47 = arith.addf %37, %46 : vector<16x128xf32>
      %48 = arith.mulf %47, %47 : vector<16x128xf32>
      %49 = arith.mulf %48, %48 : vector<16x128xf32>
      %50 = arith.mulf %49, %47 : vector<16x128xf32>
      %51 = arith.mulf %27, %50 : vector<16x128xf32>
      %cst_21 = arith.constant 1.000000e+00 : f32
      %52 = vector.broadcast %cst_21 : f32 to vector<16x128xf32>
      %53 = arith.subf %52, %51 : vector<16x128xf32>
      %54 = arith.mulf %47, %53 : vector<16x128xf32>
      %cst_22 = arith.constant 2.000000e-01 : f32
      %55 = vector.broadcast %cst_22 : f32 to vector<16x128xf32>
      %56 = arith.mulf %55, %54 : vector<16x128xf32>
      %57 = arith.addf %47, %56 : vector<16x128xf32>
      %58 = arith.mulf %57, %57 : vector<16x128xf32>
      %59 = arith.mulf %58, %58 : vector<16x128xf32>
      %60 = arith.mulf %59, %57 : vector<16x128xf32>
      %61 = arith.mulf %27, %60 : vector<16x128xf32>
      %cst_23 = arith.constant 1.000000e+00 : f32
      %62 = vector.broadcast %cst_23 : f32 to vector<16x128xf32>
      %63 = arith.subf %62, %61 : vector<16x128xf32>
      %64 = arith.mulf %57, %63 : vector<16x128xf32>
      %cst_24 = arith.constant 2.000000e-01 : f32
      %65 = vector.broadcast %cst_24 : f32 to vector<16x128xf32>
      %66 = arith.mulf %65, %64 : vector<16x128xf32>
      %67 = arith.addf %57, %66 : vector<16x128xf32>
      %68 = arith.mulf %67, %67 : vector<16x128xf32>
      %69 = arith.mulf %68, %68 : vector<16x128xf32>
      %70 = arith.mulf %69, %67 : vector<16x128xf32>
      %71 = arith.mulf %27, %70 : vector<16x128xf32>
      %cst_25 = arith.constant 1.000000e+00 : f32
      %72 = vector.broadcast %cst_25 : f32 to vector<16x128xf32>
      %73 = arith.subf %72, %71 : vector<16x128xf32>
      %74 = arith.mulf %67, %73 : vector<16x128xf32>
      %cst_26 = arith.constant 2.000000e-01 : f32
      %75 = vector.broadcast %cst_26 : f32 to vector<16x128xf32>
      %76 = arith.mulf %75, %74 : vector<16x128xf32>
      %77 = arith.addf %67, %76 : vector<16x128xf32>
      %78 = arith.mulf %77, %77 : vector<16x128xf32>
      %79 = arith.mulf %78, %78 : vector<16x128xf32>
      %80 = arith.mulf %27, %79 : vector<16x128xf32>
      %cst_27 = arith.constant 0.000000e+00 : f32
      %81 = vector.broadcast %cst_27 : f32 to vector<16x128xf32>
      %82 = arith.select %29, %80, %81 : vector<16x128xi1>, vector<16x128xf32>
      %83 = vector.shape_cast %82 : vector<16x128xf32> to vector<2x8x128xf32>
      %cst_28 = arith.constant dense<0.000000e+00> : vector<8x128xf32>
      %84 = vector.multi_reduction <add>, %83, %cst_28 [0] : vector<2x8x128xf32> to vector<8x128xf32>
      %85 = arith.addf %24, %84 : vector<8x128xf32>
      %c0_29 = arith.constant 0 : index
      %c0_30 = arith.constant 0 : index
      %86 = vector.load %arg4[%c0_29, %c0_30] : memref<8x128xf32, #tpu.memory_space<vmem>>, vector<8x128xf32>
      tpu.vector_store %arg4[%c0_29, %c0_30], %85 {strides = array<i32>} : memref<8x128xf32, #tpu.memory_space<vmem>>, vector<8x128xf32>,
    } else {
    }
    %c0_i32_9 = arith.constant 0 : i32
    %16 = arith.cmpi sgt, %12, %c0_i32_9 : i32
    %c16_i32_10 = arith.constant 16 : i32
    %17 = arith.cmpi slt, %12, %c16_i32_10 : i32
    %18 = arith.andi %16, %17 : i1
    %19 = arith.extui %18 : i1 to i32
    %c0_i32_11 = arith.constant 0 : i32
    %20 = arith.cmpi ne, %19, %c0_i32_11 : i32
    scf.if %20 {
      %c0 = arith.constant 0 : index
      %c0_15 = arith.constant 0 : index
      %24 = vector.load %arg4[%c0, %c0_15] : memref<8x128xf32, #tpu.memory_space<vmem>>, vector<8x128xf32>
      %25 = arith.index_cast %10 : i32 to index
      %c0_16 = arith.constant 0 : index
      %26 = vector.load %arg2[%25, %c0_16] : memref<16x128xf32, #tpu.memory_space<vmem>>, vector<16x128xf32>
      %27 = math.absf %26 : vector<16x128xf32>
      %cst = arith.constant 0.000000e+00 : f32
      %28 = vector.broadcast %cst : f32 to vector<16x128xf32>
      %29 = arith.cmpf ogt, %27, %28 : vector<16x128xf32>
      %30 = tpu.bitcast %27 : vector<16x128xf32> -> vector<16x128xi32>
      %31 = arith.sitofp %30 : vector<16x128xi32> to vector<16x128xf32>
      %cst_17 = arith.constant 2.000000e-01 : f32
      %32 = vector.broadcast %cst_17 : f32 to vector<16x128xf32>
      %33 = arith.mulf %32, %31 : vector<16x128xf32>
      %cst_18 = arith.constant 1.27797043E+9 : f32
      %34 = vector.broadcast %cst_18 : f32 to vector<16x128xf32>
      %35 = arith.subf %34, %33 : vector<16x128xf32>
      %36 = arith.fptosi %35 : vector<16x128xf32> to vector<16x128xi32>
      %37 = tpu.bitcast %36 : vector<16x128xi32> -> vector<16x128xf32>
      %38 = arith.mulf %37, %37 : vector<16x128xf32>
      %39 = arith.mulf %38, %38 : vector<16x128xf32>
      %40 = arith.mulf %39, %37 : vector<16x128xf32>
      %41 = arith.mulf %27, %40 : vector<16x128xf32>
      %cst_19 = arith.constant 1.000000e+00 : f32
      %42 = vector.broadcast %cst_19 : f32 to vector<16x128xf32>
      %43 = arith.subf %42, %41 : vector<16x128xf32>
      %44 = arith.mulf %37, %43 : vector<16x128xf32>
      %cst_20 = arith.constant 2.000000e-01 : f32
      %45 = vector.broadcast %cst_20 : f32 to vector<16x128xf32>
      %46 = arith.mulf %45, %44 : vector<16x128xf32>
      %47 = arith.addf %37, %46 : vector<16x128xf32>
      %48 = arith.mulf %47, %47 : vector<16x128xf32>
      %49 = arith.mulf %48, %48 : vector<16x128xf32>
      %50 = arith.mulf %49, %47 : vector<16x128xf32>
      %51 = arith.mulf %27, %50 : vector<16x128xf32>
      %cst_21 = arith.constant 1.000000e+00 : f32
      %52 = vector.broadcast %cst_21 : f32 to vector<16x128xf32>
      %53 = arith.subf %52, %51 : vector<16x128xf32>
      %54 = arith.mulf %47, %53 : vector<16x128xf32>
      %cst_22 = arith.constant 2.000000e-01 : f32
      %55 = vector.broadcast %cst_22 : f32 to vector<16x128xf32>
      %56 = arith.mulf %55, %54 : vector<16x128xf32>
      %57 = arith.addf %47, %56 : vector<16x128xf32>
      %58 = arith.mulf %57, %57 : vector<16x128xf32>
      %59 = arith.mulf %58, %58 : vector<16x128xf32>
      %60 = arith.mulf %59, %57 : vector<16x128xf32>
      %61 = arith.mulf %27, %60 : vector<16x128xf32>
      %cst_23 = arith.constant 1.000000e+00 : f32
      %62 = vector.broadcast %cst_23 : f32 to vector<16x128xf32>
      %63 = arith.subf %62, %61 : vector<16x128xf32>
      %64 = arith.mulf %57, %63 : vector<16x128xf32>
      %cst_24 = arith.constant 2.000000e-01 : f32
      %65 = vector.broadcast %cst_24 : f32 to vector<16x128xf32>
      %66 = arith.mulf %65, %64 : vector<16x128xf32>
      %67 = arith.addf %57, %66 : vector<16x128xf32>
      %68 = arith.mulf %67, %67 : vector<16x128xf32>
      %69 = arith.mulf %68, %68 : vector<16x128xf32>
      %70 = arith.mulf %69, %67 : vector<16x128xf32>
      %71 = arith.mulf %27, %70 : vector<16x128xf32>
      %cst_25 = arith.constant 1.000000e+00 : f32
      %72 = vector.broadcast %cst_25 : f32 to vector<16x128xf32>
      %73 = arith.subf %72, %71 : vector<16x128xf32>
      %74 = arith.mulf %67, %73 : vector<16x128xf32>
      %cst_26 = arith.constant 2.000000e-01 : f32
      %75 = vector.broadcast %cst_26 : f32 to vector<16x128xf32>
      %76 = arith.mulf %75, %74 : vector<16x128xf32>
      %77 = arith.addf %67, %76 : vector<16x128xf32>
      %78 = arith.mulf %77, %77 : vector<16x128xf32>
      %79 = arith.mulf %78, %78 : vector<16x128xf32>
      %80 = arith.mulf %27, %79 : vector<16x128xf32>
      %cst_27 = arith.constant 0.000000e+00 : f32
      %81 = vector.broadcast %cst_27 : f32 to vector<16x128xf32>
      %82 = arith.select %29, %80, %81 : vector<16x128xi1>, vector<16x128xf32>
      %83 = tpu.iota {dimensions = array<i32: 0>} : vector<16x128xi32>
      %84 = vector.broadcast %12 : i32 to vector<16x128xi32>
      %85 = arith.cmpi slt, %83, %84 : vector<16x128xi32>
      %cst_28 = arith.constant 0.000000e+00 : f32
      %86 = vector.broadcast %cst_28 : f32 to vector<16x128xf32>
      %87 = arith.select %85, %82, %86 : vector<16x128xi1>, vector<16x128xf32>
      %88 = vector.shape_cast %87 : vector<16x128xf32> to vector<2x8x128xf32>
      %cst_29 = arith.constant dense<0.000000e+00> : vector<8x128xf32>
      %89 = vector.multi_reduction <add>, %88, %cst_29 [0] : vector<2x8x128xf32> to vector<8x128xf32>
      %90 = arith.addf %24, %89 : vector<8x128xf32>
      %c0_30 = arith.constant 0 : index
      %c0_31 = arith.constant 0 : index
      %91 = vector.load %arg4[%c0_30, %c0_31] : memref<8x128xf32, #tpu.memory_space<vmem>>, vector<8x128xf32>
      tpu.vector_store %arg4[%c0_30, %c0_31], %90 {strides = array<i32>} : memref<8x128xf32, #tpu.memory_space<vmem>>, vector<8x128xf32>,
    } else {
    }
    %c1_i32_12 = arith.constant 1 : i32
    %c0_i32_13 = arith.constant 0 : i32
    %21 = arith.cmpi eq, %arg1, %c0_i32_13 : i32
    %22 = arith.extui %21 : i1 to i32
    %c0_i32_14 = arith.constant 0 : i32
    %23 = arith.cmpi ne, %22, %c0_i32_14 : i32
    scf.if %23 {
      %c0 = arith.constant 0 : index
      %c0_15 = arith.constant 0 : index
      %24 = vector.load %arg4[%c0, %c0_15] : memref<8x128xf32, #tpu.memory_space<vmem>>, vector<8x128xf32>
      %25 = vector.shape_cast %24 : vector<8x128xf32> to vector<1x8x128xf32>
      %cst = arith.constant dense<0.000000e+00> : vector<1xf32>
      %26 = vector.multi_reduction <add>, %25, %cst [1, 2] : vector<1x8x128xf32> to vector<1xf32>
      %27 = vector.shape_cast %26 : vector<1xf32> to vector<1x1x1xf32>
      %28 = vector.extract %27[0, 0, 0] : f32 from vector<1x1x1xf32>
      %c0_16 = arith.constant 0 : index
      %c0_17 = arith.constant 0 : index
      %29 = memref.load %arg3[%c0_16, %c0_17] : memref<1x1xf32, #tpu.memory_space<smem>>
      memref.store %28, %arg3[%c0_16, %c0_17] : memref<1x1xf32, #tpu.memory_space<smem>>
    } else {
    }
    return
  }
  func.func @transform_0(%arg0: i32, %arg1: i32) -> (i32, i32) {
    %c1_i32 = arith.constant 1 : i32
    %0 = arith.muli %arg0, %c1_i32 : i32
    %1 = arith.addi %0, %arg1 : i32
    %c0_i32 = arith.constant 0 : i32
    %2 = arith.minsi %1, %c0_i32 : i32
    %c0_i32_0 = arith.constant 0 : i32
    %c0_i32_1 = arith.constant 0 : i32
    return %2, %c0_i32_0 : i32, i32
  }
  func.func @transform_1(%arg0: i32, %arg1: i32) -> (i32, i32) {
    %c0_i32 = arith.constant 0 : i32
    %c0_i32_0 = arith.constant 0 : i32
    return %arg0, %c0_i32 : i32, i32
  }
}

</mosaic_0001>

<bundles_post_ra>
// kernel: sparsity_loss.1
= control target key start
LH: loop header
LB: loop body
LE: loop exit
PB: predicated region body
PF: predicated region fallthrough
CT: control target
= control target key end

     0   :  { %s356_s0 = inlined_call_operand.vmem [shape: f32[16,128], index: 0, kind: input, shape index: {}]   ;;  %s357_s1 = inlined_call_operand.hbm [shape: f32[1,1], index: 1, kind: output, shape index: {}]  }
   0x1   :  { %v54_v0 = vld [vmem:[%s356_s0] sm:$0xff]  ;;  %v55_v1 = vld [vmem:[%s356_s0 + $0x8] sm:$0xff] }
   0x2   :  { %6 = vsyncpa [#allocation4], 0  ;;  %v335_v2 = vand.u32 2147483647, %v54_v0  ;;  %v337_v3 = vand.u32 2147483647, %v55_v1 }
   0x3   :  { %s275_s11 = sshll.u32 %s357_s1, 4  ;;  %s318_s13 = smov [#allocation3]   ;;  %s276_s11 = int_to_ptr.hbm [resolvable:$true] %s275_s11 }
   0x4   :  { %v62_v4 = vcvt.s32.f32 %v335_v2  ;;  %v63_v5 = vcvt.s32.f32 %v337_v3  ;;  %vm58_vm2 = vcmp.gt.f32.partialorder %v335_v2, 0.0  ;;  %vm59_vm3 = vcmp.gt.f32.partialorder %v337_v3, 0.0 }
   0x6   :  { %v64_v6 = vmul.f32 0.2, %v62_v4  ;;  %v65_v7 = vmul.f32 0.2, %v63_v5 }
   0x8   :  { %v66_v8 = vsub.f32 1.2779704e+09, %v64_v6  ;;  %v67_v9 = vsub.f32 1.2779704e+09, %v65_v7 }
   0xa   :  { %vm291_vm0 = vcmp.lt.s32.totalorder %v66_v8, 0  ;;  %v292_v10 = vceil.f32 %v66_v8  ;;  %v293_v11 = vfloor.f32 %v66_v8  ;;  %vm296_vm1 = vcmp.lt.s32.totalorder %v67_v9, 0 }
   0xb   :  { %v297_v12 = vceil.f32 %v67_v9  ;;  %v298_v13 = vfloor.f32 %v67_v9 }
   0xc   :  { %v294_v14 = vsel %vm291_vm0, %v292_v10, %v293_v11 }
   0xd   :  { %v295_v15 = vcvt.f32.s32 %v294_v14  ;;  %v299_v16 = vsel %vm296_vm1, %v297_v12, %v298_v13 }
   0xe   :  { %v300_v17 = vcvt.f32.s32 %v299_v16 }
   0xf   :  { %v72_v18 = vmul.f32 %v295_v15, %v295_v15 }
  0x10   :  { %v73_v19 = vmul.f32 %v300_v17, %v300_v17 }
  0x11   :  { %v74_v20 = vmul.f32 %v72_v18, %v72_v18 }
  0x12   :  { %v75_v21 = vmul.f32 %v73_v19, %v73_v19 }
  0x13   :  { %v76_v22 = vmul.f32 %v295_v15, %v74_v20 }
  0x14   :  { %v77_v23 = vmul.f32 %v300_v17, %v75_v21 }
  0x15   :  { %v78_v24 = vmul.f32 %v76_v22, %v335_v2 }
  0x16   :  { %v79_v25 = vmul.f32 %v77_v23, %v337_v3 }
  0x17   :  { %v80_v26 = vsub.f32 1.0, %v78_v24 }
  0x18   :  { %v81_v27 = vsub.f32 1.0, %v79_v25 }
  0x19   :  { %v82_v28 = vmul.f32 %v295_v15, %v80_v26 }
  0x1a   :  { %v83_v29 = vmul.f32 %v300_v17, %v81_v27 }
  0x1b   :  { %v84_v30 = vmul.f32 0.2, %v82_v28 }
  0x1c   :  { %v85_v31 = vmul.f32 0.2, %v83_v29 }
  0x1d   :  { %v86_v32 = vadd.f32 %v295_v15, %v84_v30 }
  0x1e   :  { %v87_v33 = vadd.f32 %v300_v17, %v85_v31 }
  0x1f   :  { %v88_v34 = vmul.f32 %v86_v32, %v86_v32 }
  0x20   :  { %v89_v35 = vmul.f32 %v87_v33, %v87_v33 }
  0x21   :  { %v90_v36 = vmul.f32 %v88_v34, %v88_v34 }
  0x22   :  { %v91_v37 = vmul.f32 %v89_v35, %v89_v35 }
  0x23   :  { %v92_v38 = vmul.f32 %v90_v36, %v86_v32 }
  0x24   :  { %v93_v39 = vmul.f32 %v91_v37, %v87_v33 }
  0x25   :  { %v94_v40 = vmul.f32 %v92_v38, %v335_v2 }
  0x26   :  { %v95_v41 = vmul.f32 %v93_v39, %v337_v3 }
  0x27   :  { %v96_v42 = vsub.f32 1.0, %v94_v40 }
  0x28   :  { %v97_v43 = vsub.f32 1.0, %v95_v41 }
  0x29   :  { %v98_v44 = vmul.f32 %v96_v42, %v86_v32 }
  0x2a   :  { %v99_v45 = vmul.f32 %v97_v43, %v87_v33 }
  0x2b   :  { %v100_v46 = vmul.f32 0.2, %v98_v44 }
  0x2c   :  { %v101_v47 = vmul.f32 0.2, %v99_v45 }
  0x2d   :  { %v102_v48 = vadd.f32 %v100_v46, %v86_v32 }
  0x2e   :  { %v103_v49 = vadd.f32 %v101_v47, %v87_v33 }
  0x2f   :  { %v104_v50 = vmul.f32 %v102_v48, %v102_v48 }
  0x30   :  { %v105_v51 = vmul.f32 %v103_v49, %v103_v49 }
  0x31   :  { %v106_v52 = vmul.f32 %v104_v50, %v104_v50 }
  0x32   :  { %v107_v53 = vmul.f32 %v105_v51, %v105_v51 }
  0x33   :  { %v108_v54 = vmul.f32 %v106_v52, %v102_v48 }
  0x34   :  { %v109_v55 = vmul.f32 %v107_v53, %v103_v49 }
  0x35   :  { %v110_v56 = vmul.f32 %v108_v54, %v335_v2 }
  0x36   :  { %v111_v57 = vmul.f32 %v109_v55, %v337_v3 }
  0x37   :  { %v112_v58 = vsub.f32 1.0, %v110_v56 }
  0x38   :  { %v113_v59 = vsub.f32 1.0, %v111_v57 }
  0x39   :  { %v114_v60 = vmul.f32 %v112_v58, %v102_v48 }
  0x3a   :  { %v115_v61 = vmul.f32 %v113_v59, %v103_v49 }
  0x3b   :  { %v116_v62 = vmul.f32 0.2, %v114_v60 }
  0x3c   :  { %v117_v63 = vmul.f32 0.2, %v115_v61 }
  0x3d   :  { %v118_v0 = vadd.f32 %v116_v62, %v102_v48 }
  0x3e   :  { %v119_v1 = vadd.f32 %v117_v63, %v103_v49 }
  0x3f   :  { %v120_v4 = vmul.f32 %v118_v0, %v118_v0 }
  0x40   :  { %v121_v5 = vmul.f32 %v119_v1, %v119_v1 }
  0x41   :  { %v122_v6 = vmul.f32 %v120_v4, %v120_v4 }
  0x42   :  { %v123_v7 = vmul.f32 %v121_v5, %v121_v5 }
  0x43   :  { %v124_v8 = vmul.f32 %v122_v6, %v118_v0 }
  0x44   :  { %v125_v9 = vmul.f32 %v123_v7, %v119_v1 }
  0x45   :  { %v126_v10 = vmul.f32 %v124_v8, %v335_v2 }
  0x46   :  { %v127_v11 = vmul.f32 %v125_v9, %v337_v3 }
  0x47   :  { %v128_v12 = vsub.f32 1.0, %v126_v10 }
  0x48   :  { %v129_v13 = vsub.f32 1.0, %v127_v11 }
  0x49   :  { %v130_v14 = vmul.f32 %v128_v12, %v118_v0 }
  0x4a   :  { %v131_v15 = vmul.f32 %v129_v13, %v119_v1 }
  0x4b   :  { %v132_v16 = vmul.f32 0.2, %v130_v14 }
  0x4c   :  { %v133_v17 = vmul.f32 0.2, %v131_v15 }
  0x4d   :  { %v134_v18 = vadd.f32 %v132_v16, %v118_v0 }
  0x4e   :  { %v135_v19 = vadd.f32 %v133_v17, %v119_v1 }
  0x4f   :  { %v136_v20 = vmul.f32 %v134_v18, %v134_v18 }
  0x50   :  { %v137_v21 = vmul.f32 %v135_v19, %v135_v19 }
  0x51   :  { %v138_v22 = vmul.f32 %v136_v20, %v136_v20 }
  0x52   :  { %v139_v23 = vmul.f32 %v137_v21, %v137_v21 }
  0x53   :  { %v140_v24 = vmul.f32 %v138_v22, %v335_v2 }
  0x54   :  { %v141_v25 = vmul.f32 %v139_v23, %v337_v3 }
  0x55   :  { %v142_v26 = vsel %vm58_vm2, %v140_v24, 0.0 }
  0x56   :  { %v143_v27 = vsel %vm59_vm3, %v141_v25, 0.0 }
  0x57   :  { %v144_v28 = vadd.f32 %v143_v27, %v142_v26 }
  0x59   :  { %259 = vadd.xlane.f32.xlu0 %v144_v28 }
  0xcc   :  { %v260_v29 = vpop.xlane.xlu0 %259 }
  0xcd   :  { %v261_v30 = vrot.slane %v260_v29, 4 }
  0xcf   :  { %v262_v31 = vadd.f32 %v261_v30, %v260_v29 }
  0xd1   :  { %v263_v32 = vrot.slane %v262_v31, 2 }
  0xd3   :  { %v264_v33 = vadd.f32 %v263_v32, %v262_v31 }
  0xd5   :  { %v265_v34 = vrot.slane %v264_v33, 1 }
  0xd7   :  { %v266_v35 = vadd.f32 %v265_v34, %v264_v33 }
  0xd9   :  { %301 = vpush %v266_v35 }
 0x10a   :  { %s302_s12 = spop %301 }
 0x10b   :  { %269 = sst [smem:[#allocation3]] %s302_s12 }
 0x10c   :  { %278 = dma.smem_to_hbm %s318_s13, 16, %s276_s11, [#allocation4]  }
 0x10d   :  { %316 = dma.done.wait [#allocation4], 16  }
 0x10e   :  { %317 = vsyncadd [#allocation4], 4294967280 }
 0x10f   :  { %283 = sfence }
 0x110   :  { %284 = vsyncpa [#allocation4], 1 }

</bundles_post_ra>
